<compile_context>
chip_gen: v6e
topology: v6e:2x2x1
jax: 0.10.0
libtpu: 0.0.40
codegen_flags: <defaults>
</compile_context>

<pallas_src>
import functools

import jax
import jax.numpy as jnp
from jax import lax
from jax.experimental import pallas as pl
from jax.experimental.pallas import tpu as pltpu


def seqpool_kernel(x_ref, w_ref, o_ref, *, sub):
    """x_ref: (bt, S, D) input tile; w_ref: (1, D) linear weight; o_ref: (bt, D)."""
    w = w_ref[...].astype(jnp.float32)                 # (1, D)
    bt = x_ref.shape[0]
    n_sub = bt // sub

    def body(i, carry):
        r = pl.multiple_of(i * sub, sub)
        x = x_ref[pl.ds(r, sub), :, :].astype(jnp.float32)            # (sub, S, D)
        # logits[b, s] = <x[b, s, :], w>   (bias dropped: softmax is shift-invariant)
        logits = jnp.sum(x * w[None, :, :], axis=-1, keepdims=True)   # (sub, S, 1)
        # softmax over the sequence axis, fused with the weighted pooling
        m = jnp.max(logits, axis=1, keepdims=True)                    # (sub, 1, 1)
        e = jnp.exp(logits - m)                                       # (sub, S, 1)
        denom = jnp.sum(e, axis=1, keepdims=True)                     # (sub, 1, 1)
        acc = jnp.sum(e * x, axis=1)                                  # (sub, D)
        # exact normalization on the small pooled result (not on the (sub,S,1) weights)
        out = acc / denom[:, :, 0]                                    # (sub, D)
        o_ref[pl.ds(r, sub), :] = out.astype(o_ref.dtype)
        return carry

    lax.fori_loop(0, n_sub, body, 0, unroll=(n_sub <= 8))


def _pick_bt(B, S, D, itemsize, target_bytes):
    """Pick a batch tile so each grid step moves ~target_bytes of x (lane-padded)."""
    d_lanes = pl.cdiv(D, 128) * 128           # D < 128 still occupies 128 lanes in VMEM
    row_bytes = max(1, S * d_lanes * itemsize)
    bt = max(1, int(target_bytes // row_bytes))
    if bt >= B:
        if B >= 16:
            # whole batch fits in one step; split in two (sublane-aligned) so both
            # TensorCores get work on v7x under "parallel" semantics.
            bt = ((pl.cdiv(B, 2) + 7) // 8) * 8
        else:
            bt = B
    else:
        bt = max(8, (bt // 8) * 8)            # sublane-align the output block
    return bt


def _pick_sub(bt):
    """Largest convenient batch sub-slab that divides bt."""
    for cand in (64, 32, 16, 8):
        if bt % cand == 0:
            return cand
    return bt


def sequence_pooling(x, weight, bias=None, *, bt=None, target_tile_bytes=8 << 20):
    """x: (B, S, D); weight: (1, D) = nn.Linear(d_model, 1).weight; bias unused
    (softmax shift-invariance makes it a no-op).  Returns (B, D) float32."""
    del bias  # mathematically irrelevant: softmax(logits + c) == softmax(logits)
    B, S, D = x.shape
    itemsize = jnp.dtype(x.dtype).itemsize

    if bt is None:
        bt = _pick_bt(B, S, D, itemsize, target_tile_bytes)
    bt = int(bt)

    # Ragged batch: pad B up to a multiple of bt, slice the result afterwards.
    B_pad = pl.cdiv(B, bt) * bt
    if B_pad != B:
        x = jnp.pad(x, ((0, B_pad - B), (0, 0), (0, 0)))
    grid = B_pad // bt
    sub = _pick_sub(bt)

    # VMEM budget: double-buffered x tile (lane-padded) + headroom; keep v7x-safe.
    d_lanes = pl.cdiv(D, 128) * 128
    tile_bytes = bt * S * d_lanes * itemsize
    vmem_limit = int(min(64 << 20, max(32 << 20, 3 * tile_bytes)))

    w = weight.reshape(1, D)

    grid_spec = pltpu.PrefetchScalarGridSpec(
        num_scalar_prefetch=0,
        grid=(grid,),
        in_specs=[
            pl.BlockSpec((bt, S, D), lambda i: (i, 0, 0)),
            pl.BlockSpec((1, D), lambda i: (0, 0)),
        ],
        out_specs=pl.BlockSpec((bt, D), lambda i: (i, 0)),
        scratch_shapes=[],
    )

    out = pl.pallas_call(
        functools.partial(seqpool_kernel, sub=sub),
        out_shape=jax.ShapeDtypeStruct((B_pad, D), jnp.float32),
        grid_spec=grid_spec,
        compiler_params=pltpu.CompilerParams(
            dimension_semantics=("parallel",),
            vmem_limit_bytes=vmem_limit,
        ),
    )(x, w)
    return out[:B]


def reference_forward(x, weight, bias):
    """Pure-JAX replica of the PyTorch module (eval mode), bias included."""
    w = x @ weight.reshape(-1, 1) + bias.reshape(1, 1, 1)   # (B, S, 1)
    w = jnp.swapaxes(w, 1, 2)                               # (B, 1, S)
    w = jax.nn.softmax(w, axis=-1)
    out = jnp.matmul(w, x)                                  # (B, 1, D)
    return out[:, 0, :]                                     # squeeze -> (B, D)


if __name__ == "__main__":
    B, S, D = 16, 16, 64            # small demo shapes; grid = 2 parallel steps of 8
    key = jax.random.PRNGKey(0)
    kx, kw, kb = jax.random.split(key, 3)
    x = jax.random.normal(kx, (B, S, D), jnp.float32)
    weight = jax.random.normal(kw, (1, D), jnp.float32) * 0.05
    bias = jax.random.normal(kb, (1,), jnp.float32) * 0.05

    out = sequence_pooling(x, weight, bias)
    out = jax.block_until_ready(out)

    ref = reference_forward(x, weight, bias)
    assert out.shape == (B, D)
    err = float(jnp.max(jnp.abs(out - ref)))
    # exact softmax normalization now -> tight tolerance
    assert jnp.allclose(out, ref, atol=1e-5, rtol=1e-5), err

    print("KERNEL_OK")
</pallas_src>

<mosaic_0001>
module attributes {stable_mosaic.version = 11 : i64} {
  func.func @seqpool_kernel(%arg0: i32, %arg1: memref<8x16x64xf32, #tpu.memory_space<vmem>>, %arg2: memref<1x64xf32, #tpu.memory_space<vmem>>, %arg3: memref<8x64xf32, #tpu.memory_space<vmem>>) attributes {dimension_semantics = [#tpu.dimension_semantics<parallel>], iteration_bounds = array<i64: 2>, scalar_prefetch = 0 : i64, scratch_operands = 0 : i64, tpu.core_type = #tpu.core_type<tc>, window_params = [{transform_indices = @transform_0, window_bounds = array<i64: 8, 16, 64>}, {pipeline_mode = #tpu.pipeline_mode<synchronous>, transform_indices = @transform_1, window_bounds = array<i64: 1, 64>}, {transform_indices = @transform_2, window_bounds = array<i64: 8, 64>}]} {
    %c0 = arith.constant 0 : index
    %c0_0 = arith.constant 0 : index
    %0 = vector.load %arg2[%c0, %c0_0] : memref<1x64xf32, #tpu.memory_space<vmem>>, vector<1x64xf32>
    %c0_i32 = arith.constant 0 : i32
    %c8_i32 = arith.constant 8 : i32
    %1 = arith.muli %c0_i32, %c8_i32 : i32
    %2 = tpu.assume_multiple %1, 8 : i32
    %3 = arith.index_cast %2 : i32 to index
    %c0_1 = arith.constant 0 : index
    %c0_2 = arith.constant 0 : index
    %4 = vector.load %arg1[%3, %c0_1, %c0_2] : memref<8x16x64xf32, #tpu.memory_space<vmem>>, vector<8x16x64xf32>
    %5 = vector.shape_cast %0 : vector<1x64xf32> to vector<1x1x64xf32>
    %6 = vector.broadcast %5 : vector<1x1x64xf32> to vector<8x16x64xf32>
    %7 = arith.mulf %4, %6 : vector<8x16x64xf32>
    %cst = arith.constant dense<0.000000e+00> : vector<8x16xf32>
    %8 = vector.multi_reduction <add>, %7, %cst [2] : vector<8x16x64xf32> to vector<8x16xf32>
    %9 = vector.shape_cast %8 : vector<8x16xf32> to vector<8x16x1xf32>
    %cst_3 = arith.constant dense<0xFF800000> : vector<8x1xf32>
    %10 = vector.multi_reduction <maximumf>, %9, %cst_3 [1] : vector<8x16x1xf32> to vector<8x1xf32>
    %11 = vector.shape_cast %10 : vector<8x1xf32> to vector<8x1x1xf32>
    %12 = vector.broadcast %11 : vector<8x1x1xf32> to vector<8x16x1xf32>
    %13 = arith.subf %9, %12 : vector<8x16x1xf32>
    %14 = math.exp %13 : vector<8x16x1xf32>
    %cst_4 = arith.constant dense<0.000000e+00> : vector<8x1xf32>
    %15 = vector.multi_reduction <add>, %14, %cst_4 [1] : vector<8x16x1xf32> to vector<8x1xf32>
    %16 = vector.shape_cast %15 : vector<8x1xf32> to vector<8x1x1xf32>
    %17 = vector.broadcast %14 : vector<8x16x1xf32> to vector<8x16x64xf32>
    %18 = arith.mulf %17, %4 : vector<8x16x64xf32>
    %cst_5 = arith.constant dense<0.000000e+00> : vector<8x64xf32>
    %19 = vector.multi_reduction <add>, %18, %cst_5 [1] : vector<8x16x64xf32> to vector<8x64xf32>
    %20 = vector.shape_cast %16 : vector<8x1x1xf32> to vector<8x1xf32>
    %21 = vector.broadcast %20 : vector<8x1xf32> to vector<8x64xf32>
    %22 = arith.divf %19, %21 : vector<8x64xf32>
    %23 = arith.index_cast %2 : i32 to index
    %c0_6 = arith.constant 0 : index
    %24 = vector.load %arg3[%23, %c0_6] : memref<8x64xf32, #tpu.memory_space<vmem>>, vector<8x64xf32>
    tpu.vector_store %arg3[%23, %c0_6], %22 {strides = array<i32>} : memref<8x64xf32, #tpu.memory_space<vmem>>, vector<8x64xf32>,
    %c1_i32 = arith.constant 1 : i32
    return
  }
  func.func @transform_0(%arg0: i32) -> (i32, i32, i32) {
    %c0_i32 = arith.constant 0 : i32
    %c0_i32_0 = arith.constant 0 : i32
    %c0_i32_1 = arith.constant 0 : i32
    return %arg0, %c0_i32, %c0_i32_0 : i32, i32, i32
  }
  func.func @transform_1(%arg0: i32) -> (i32, i32) {
    %c0_i32 = arith.constant 0 : i32
    %c0_i32_0 = arith.constant 0 : i32
    %c0_i32_1 = arith.constant 0 : i32
    return %c0_i32, %c0_i32_0 : i32, i32
  }
  func.func @transform_2(%arg0: i32) -> (i32, i32) {
    %c0_i32 = arith.constant 0 : i32
    %c0_i32_0 = arith.constant 0 : i32
    return %arg0, %c0_i32 : i32, i32
  }
}

</mosaic_0001>

<bundles_post_ra>
// kernel: tpu_custom_call.1
= control target key start
LH: loop header
LB: loop body
LE: loop exit
PB: predicated region body
PF: predicated region fallthrough
CT: control target
= control target key end

     0   :  { %7 = vsyncpa [#allocation3], 0  ;;  %s1183_s0 = inlined_call_operand.hbm [shape: f32[16,16,64], index: 0, kind: input, shape index: {}]   ;;  %s1184_s1 = inlined_call_operand.vmem [shape: f32[1,64], index: 1, kind: input, shape index: {}]   ;;  %s1185_s2 = inlined_call_operand.hbm [shape: f32[16,64], index: 2, kind: output, shape index: {}]  }
   0x1   :  { %9 = vsyncpa [#allocation3 + $0x1], 0 }
   0x2   :  { %10 = vsyncpa [#allocation4], 0 }
   0x3   :  { %12 = vsyncpa [#allocation4 + $0x1], 0  ;;  %s852_s9 = smov 0   ;;  %s854_s10 = smov 0  }
   0x4   :  { %s856_s11 = smov 0   ;;  %s858_s12 = smov 0  }
   0x5 LB: > { %s873_s13 = sadd.s32 4294967295, %s831_s12   ;;  %s626_s14 = sadd.s32 4294967294, %s831_s12   ;;  %s831_s12 = sphi %s858_s12, %s1200_s12   ;;  %s827_s11 = sphi %s856_s11, %s1199_s11   ;;  %s823_s10 = sphi %s854_s10, %s1198_s10   ;;  %s819_s9 = sphi %s852_s9, %s1197_s9  }
   0x6   : > { %s877_s15 = sadd.s32 1, %s831_s12   ;;  %s25_s16 = sadd.s32 1, %s827_s11 }
   0x7   : > { %s22_s17 = ssub.s32 %s831_s12, %s877_s15  ;;  %p32_p0 = scmp.ne.s32.totalorder %s827_s11, %s823_s10 }
   0x8   : > { %p23_p1 = scmp.eq.s32.totalorder %s22_s17, 0  ;;  %p33_p2 = scmp.eq.s32.totalorder %s831_s12, 0 }
   0x9   : > { %p38_p3 = scmp.ne.s32.totalorder %s823_s10, %s819_s9  ;;  %p39_p4 = scmp.eq.s32.totalorder %s873_s13, 0 }
   0xa   : > { %s889_s18 = scalar_select %p23_p1, %s827_s11, %s25_s16  }
   0xb   : > { %p891_p5 = por %p33_p2, %p32_p0  ;;  %p895_p6 = por %p39_p4, %p38_p3 }
   0xc   : > { %p83_p7 = scmp.eq.s32.totalorder %s873_s13, 1  ;;  %p89_p8 = scmp.eq.s32.totalorder %s626_s14, 1 }
   0xd   : > { %s1189_s20 = scalar_select %p895_p6, 1, 0 }
   0xe   : > { %p655_p10 = scmp.lt.s32.totalorder %s831_s12, 2  ;;  %p902_p11 = por %p83_p7, %p32_p0 }
   0xf   : > { %p906_p12 = por %p89_p8, %p38_p3  ;;  %s112_s23 = sand.u32 1, %s827_s11  }
  0x10   : > { %s1190_s21 = scalar_select %p902_p11, 1, 0 }
  0x11   : > { %s1191_s22 = scalar_select %p906_p12, 1, 0 }
  0x12   : > { %s642_s24 = sshll.u32 %s831_s12, 11  ;;  %s629_s25 = sshll.u32 %s112_s23, 7 }
  0x13   : > { %s915_s28 = scalar_lea.hbm %s1183_s0, %s642_s24  ;;  %s116_s29 = scalar_lea.vmem [#allocation2], %s629_s25 }
  0x14   : > { %s124_s30 = sshll.u32 %s116_s29, 4  ;;  %p919_p13 = pnand %p655_p10, %p891_p5  ;;  %s923_s30 = int_to_ptr.vmem [resolvable:$true] %s124_s30 }
  0x15   : > { %s925_s4 = scalar_lea.sflag [#allocation3], %s112_s23  ;;  %s739_s5 = scalar_lea.hbm %s915_s28, 2048 }
  0x16   : > { %p740_p0 = scmp.ne.s32.totalorder %s915_s28, %s739_s5  ;;  %p741_p1 = pneg %p919_p13 }
  0x17   : > { %s744_s8 = scalar_lea.hbm %s1183_s0, 4096  ;;  %p745_p4 = scmp.lt.s32.totalorder %s915_s28, %s1183_s0 }
  0x18   : > { %p742_p2 = pnand %p741_p1, %p740_p0  ;;  %p746_p5 = scmp.lt.s32.totalorder %s744_s8, %s739_s5 }
  0x1a   : > { %p743_p3 = pneg %p742_p2  ;;  %p747_p7 = por %p746_p5, %p745_p4 }
  0x1c   : > { %p748_p8 = pnand %p747_p7, %p743_p3 }
  0x1e   : > { %751 = shalt.err (!%p748_p8)
}
  0x1f   : > { %s752_s17 = scalar_lea.vmem %s923_s30, 2048  ;;  %s833_s19 = smov [#allocation2]  }
  0x20   : > { %p753_p10 = scmp.ne.s32.totalorder %s923_s30, %s752_s17  ;;  %s757_s23 = sshll.u32 %s833_s19, 4  ;;  %s758_s23 = int_to_ptr.vmem [resolvable:$false] %s757_s23 }
  0x21   : > { %s759_s24 = scalar_lea.vmem %s758_s23, 4096  ;;  %p760_p2 = scmp.lt.s32.totalorder %s923_s30, %s758_s23 }
  0x22   : > { %p755_p9 = pnand %p753_p10, %p741_p1  ;;  %p761_p12 = scmp.lt.s32.totalorder %s759_s24, %s752_s17 }
  0x24   : > { %p756_p0 = pneg %p755_p9  ;;  %p762_p11 = por %p761_p12, %p760_p2 }
  0x26   : > { %p763_p6 = pnand %p762_p11, %p756_p0 }
  0x28   : > { %766 = shalt.err (!%p763_p6)
}
  0x29   : > { %s834_s25 = smov 128   ;;  %s835_s26 = smov 8  }
  0x2a   : > { %650 = dma.hbm_to_vmem [thread:$0]  (!%p919_p13), %s915_s28, 2048, %s923_s30, %s925_s4, %s834_s25, %s834_s25, %s835_s26  }
  0x2b   : > { %p633_p9 = scmp.ge.s32.totalorder %s831_s12, 1  ;;  %p132_p1 = scmp.lt.s32.totalorder %s831_s12, 3 }
  0x2d   : > { %p133_p3 = pnand %p633_p9, %p132_p1 }
  0x2e   : > { %s949_s27 = sand.u32 (!%p133_p3), 1, %s823_s10   ;;  %p1193_p6 = scmp.ne.s32.totalorder (!%p133_p3), %s1189_s20, 0 }
  0x2f   : > { %136 = sbr.rel (%p133_p3) target bundleno = 305 (0x131), region = 28  ;;  %s634_s29 = sshll.u32 (!%p133_p3), %s949_s27, 7 }
  0x30   : > { %s139_s5 = scalar_lea.sflag (!%p133_p3), [#allocation3], %s949_s27  ;;  %s953_s6 = scalar_lea.vmem (!%p133_p3), [#allocation2], %s634_s29 }
  0x34   : > { %810 = dma.done.wait (%p1193_p6), %s139_s5, 2048  }
  0x35   : > { %812 = vsyncadd (%p1193_p6), %s139_s5, 4294965248  ;;  %v636_v0 = vld [vmem:[%s1184_s1] ss:$0 sm:$0xff]  ;;  %v963_v1 = vld [vmem:[%s953_s6 + $0x10] sm:$0xff]  ;;  %vm205_vm0 = vcmask 523264   ;;  %s635_s20 = sshll.u32 %s949_s27, 3 }
  0x36   : > { %v966_v2 = vld [vmem:[%s953_s6] sm:$0xff]  ;;  %v191_v3 = vmul.f32 %v636_v0, %v963_v1  ;;  %v971_v5 = vld [vmem:[%s953_s6 + $0x18] sm:$0xff]  ;;  %v974_v6 = vld [vmem:[%s953_s6 + $0x8] sm:$0xff]  ;;  %vm526_vm1 = vcmask 1041409   ;;  %vm528_vm2 = vcmask 1042434   ;;  %vm530_vm3 = vcmask 1043459  }
  0x37   : > { %v189_v4 = vmul.f32 %v636_v0, %v966_v2  ;;  %v192_v7 = vmul.f32 %v636_v0, %v971_v5  ;;  %v190_v8 = vmul.f32 %v636_v0, %v974_v6  ;;  %v979_v9 = vld [vmem:[%s953_s6 + $0x28] sm:$0xff]  ;;  %v982_v10 = vld [vmem:[%s953_s6 + $0x20] sm:$0xff]  ;;  %v991_v17 = vld [vmem:[%s953_s6 + $0x38] sm:$0xff]  ;;  %vm532_vm4 = vcmask 1044484   ;;  %s638_s3 = sshll.u32 %s873_s13, 7  ;;  %s162_s4 = scalar_lea.vmem [#allocation5], %s635_s20 }
  0x38   : > { %v212_v11 = vsel %vm205_vm0, %v191_v3, 0.0  ;;  %v194_v15 = vmul.f32 %v636_v0, %v979_v9  ;;  %v193_v16 = vmul.f32 %v636_v0, %v982_v10  ;;  %v994_v18 = vld [vmem:[%s953_s6 + $0x30] sm:$0xff]  ;;  %v196_v21 = vmul.f32 %v636_v0, %v991_v17  ;;  %v1001_v23 = vld [vmem:[%s953_s6 + $0x48] sm:$0xff]  ;;  %v1004_v24 = vld [vmem:[%s953_s6 + $0x40] sm:$0xff]  ;;  %s556_s7 = sshll.u32 %s162_s4, 4  ;;  %s1145_s16 = scalar_lea.hbm %s1185_s2, %s638_s3  ;;  %s557_s7 = int_to_ptr.vmem [resolvable:$true] %s556_s7 }
  0x39   : > { %v206_v12 = vsel %vm205_vm0, %v189_v4, 0.0  ;;  %213 = vadd.xlane.f32.xlu1 %v212_v11  ;;  %v215_v13 = vsel %vm205_vm0, %v192_v7, 0.0  ;;  %v209_v14 = vsel %vm205_vm0, %v190_v8, 0.0  ;;  %v195_v22 = vmul.f32 %v636_v0, %v994_v18  ;;  %v1011_v29 = vld [vmem:[%s953_s6 + $0x58] sm:$0xff]  ;;  %v1014_v30 = vld [vmem:[%s953_s6 + $0x50] sm:$0xff]  ;;  %v1021_v35 = vld [vmem:[%s953_s6 + $0x68] sm:$0xff] }
  0x3a   : > { %207 = vadd.xlane.f32.xlu0 %v206_v12  ;;  %v221_v19 = vsel %vm205_vm0, %v194_v15, 0.0  ;;  %v218_v20 = vsel %vm205_vm0, %v193_v16, 0.0  ;;  %v227_v25 = vsel %vm205_vm0, %v196_v21, 0.0  ;;  %v198_v27 = vmul.f32 %v636_v0, %v1001_v23  ;;  %v1024_v36 = vld [vmem:[%s953_s6 + $0x60] sm:$0xff]  ;;  %v1031_v41 = vld [vmem:[%s953_s6 + $0x78] sm:$0xff]  ;;  %v1034_v42 = vld [vmem:[%s953_s6 + $0x70] sm:$0xff] }
  0x3b   : > { %v224_v26 = vsel %vm205_vm0, %v195_v22, 0.0  ;;  %v197_v28 = vmul.f32 %v636_v0, %v1004_v24  ;;  %v200_v33 = vmul.f32 %v636_v0, %v1011_v29  ;;  %v199_v34 = vmul.f32 %v636_v0, %v1014_v30  ;;  %s543_s17 = scalar_lea.sflag [#allocation4], %s949_s27  ;;  %s767_s13 = scalar_lea.vmem %s557_s7, 128 }
  0x3c   : > { %v233_v31 = vsel %vm205_vm0, %v198_v27, 0.0  ;;  %v202_v39 = vmul.f32 %v636_v0, %v1021_v35  ;;  %v201_v40 = vmul.f32 %v636_v0, %v1024_v36  ;;  %v204_v45 = vmul.f32 %v636_v0, %v1031_v41  ;;  %p768_p11 = scmp.ne.s32.totalorder %s557_s7, %s767_s13  ;;  %p1194_p12 = scmp.ne.s32.totalorder %s1190_s21, 0 }
  0x3d   : > { %216 = vadd.xlane.f32.xlu1 %v215_v13  ;;  %v230_v32 = vsel %vm205_vm0, %v197_v28, 0.0  ;;  %v239_v37 = vsel %vm205_vm0, %v200_v33, 0.0  ;;  %v236_v38 = vsel %vm205_vm0, %v199_v34, 0.0  ;;  %v203_v46 = vmul.f32 %v636_v0, %v1034_v42  ;;  %s836_s19 = smov [#allocation5]  }
  0x3e   : > { %210 = vadd.xlane.f32.xlu0 %v209_v14  ;;  %v245_v43 = vsel %vm205_vm0, %v202_v39, 0.0  ;;  %v242_v44 = vsel %vm205_vm0, %v201_v40, 0.0  ;;  %v251_v47 = vsel %vm205_vm0, %v204_v45, 0.0  ;;  %vm534_vm5 = vcmask 1045509   ;;  %p769_p13 = pnand %p768_p11, %p1194_p12  ;;  %s771_s23 = sshll.u32 %s836_s19, 4  ;;  %s772_s23 = int_to_ptr.vmem [resolvable:$false] %s771_s23 }
  0x3f   : > { %v248_v48 = vsel %vm205_vm0, %v203_v46, 0.0  ;;  %vm536_vm6 = vcmask 1046534   ;;  %vm538_vm7 = vcmask 1047559   ;;  %s773_s24 = scalar_lea.vmem %s772_s23, 256  ;;  %p774_p5 = scmp.lt.s32.totalorder %s557_s7, %s772_s23 }
  0x40   : > { %p770_p4 = pneg %p769_p13  ;;  %p775_p7 = scmp.lt.s32.totalorder %s773_s24, %s767_s13 }
  0x41   : > { %222 = vadd.xlane.f32.xlu1 %v221_v19 }
  0x42   : > { %219 = vadd.xlane.f32.xlu0 %v218_v20  ;;  %p776_p8 = por %p775_p7, %p774_p5 }
  0x44   : > { %p777_p10 = pnand %p776_p8, %p770_p4 }
  0x45   : > { %228 = vadd.xlane.f32.xlu1 %v227_v25 }
  0x46   : > { %225 = vadd.xlane.f32.xlu0 %v224_v26 }
  0x49   : > { %234 = vadd.xlane.f32.xlu1 %v233_v31 }
  0x4a   : > { %231 = vadd.xlane.f32.xlu0 %v230_v32 }
  0x4d   : > { %240 = vadd.xlane.f32.xlu1 %v239_v37 }
  0x4e   : > { %237 = vadd.xlane.f32.xlu0 %v236_v38 }
  0x51   : > { %246 = vadd.xlane.f32.xlu1 %v245_v43 }
  0x52   : > { %243 = vadd.xlane.f32.xlu0 %v242_v44 }
  0x55   : > { %252 = vadd.xlane.f32.xlu1 %v251_v47 }
  0x56   : > { %249 = vadd.xlane.f32.xlu0 %v248_v48 }
  0xc2   : > { %v214_v49 = vpop.xlane.xlu1 %213 }
  0xc3   : > { %v1042_v50 = vpop.xlane.xlu0 %207 }
  0xc6   : > { %v217_v51 = vpop.xlane.xlu1 %216 }
  0xc7   : > { %v1044_v52 = vpop.xlane.xlu0 %210  ;;  %v261_v53 = vmax.f32 %v214_v49, %v217_v51 }
  0xc8   : > { %v254_v54 = vmax.f32 %v1042_v50, %v1044_v52 }
  0xc9   : > { %v262_v55 = vrot.slane %v261_v53, 4 }
  0xca   : > { %v1048_v56 = vpop.xlane.xlu1 %222  ;;  %v255_v59 = vrot.slane %v254_v54, 4 }
  0xcb   : > { %v1050_v57 = vpop.xlane.xlu0 %219  ;;  %v263_v60 = vmax.f32 %v261_v53, %v262_v55 }
  0xcc   : > { %v268_v58 = vmax.f32 %v1050_v57, %v1048_v56  ;;  %v256_v3 = vmax.f32 %v254_v54, %v255_v59 }
  0xcd   : > { %v264_v4 = vrot.slane %v263_v60, 2 }
  0xce   : > { %v269_v61 = vrot.slane %v268_v58, 4  ;;  %v1054_v62 = vpop.xlane.xlu1 %228  ;;  %v257_v13 = vrot.slane %v256_v3, 2 }
  0xcf   : > { %v1056_v63 = vpop.xlane.xlu0 %225  ;;  %v265_v16 = vmax.f32 %v263_v60, %v264_v4 }
  0xd0   : > { %v275_v0 = vmax.f32 %v1056_v63, %v1054_v62  ;;  %v270_v8 = vmax.f32 %v268_v58, %v269_v61  ;;  %v258_v26 = vmax.f32 %v256_v3, %v257_v13 }
  0xd1   : > { %v266_v31 = vrot.slane %v265_v16, 1 }
  0xd2   : > { %v276_v7 = vrot.slane %v275_v0, 4  ;;  %v1060_v11 = vpop.xlane.xlu1 %234  ;;  %v271_v19 = vrot.slane %v270_v8, 2  ;;  %v259_v40 = vrot.slane %v258_v26, 1 }
  0xd3   : > { %v1062_v12 = vpop.xlane.xlu0 %231  ;;  %v267_v44 = vmax.f32 %v265_v16, %v266_v31 }
  0xd4   : > { %v277_v14 = vmax.f32 %v275_v0, %v276_v7  ;;  %v282_v15 = vmax.f32 %v1062_v12, %v1060_v11  ;;  %v272_v33 = vmax.f32 %v270_v8, %v271_v19  ;;  %v260_v53 = vmax.f32 %v258_v26, %v259_v40 }
  0xd5   : > { %v312_v58 = vsub.f32 %v214_v49, %v267_v44  ;;  %v313_v59 = vsub.f32 %v217_v51, %v267_v44 }
  0xd6   : > { %v283_v20 = vrot.slane %v282_v15, 4  ;;  %v1066_v21 = vpop.xlane.xlu1 %240  ;;  %v278_v27 = vrot.slane %v277_v14, 2  ;;  %v273_v46 = vrot.slane %v272_v33, 1  ;;  %v310_v3 = vsub.f32 %v1042_v50, %v260_v53 }
  0xd7   : > { %v1068_v22 = vpop.xlane.xlu0 %237  ;;  %v330_v8 = vmul.f32 1.442695, %v312_v58  ;;  %v311_v13 = vsub.f32 %v1044_v52, %v260_v53 }
  0xd8   : > { %v289_v25 = vmax.f32 %v1068_v22, %v1066_v21  ;;  %v284_v28 = vmax.f32 %v282_v15, %v283_v20  ;;  %v279_v43 = vmax.f32 %v277_v14, %v278_v27  ;;  %v274_v60 = vmax.f32 %v272_v33, %v273_v46 }
  0xd9   : > { %v332_v14 = vmul.f32 1.442695, %v313_v59  ;;  %691 = vpow2.f32 %v330_v8  ;;  %v328_v26 = vmul.f32 1.442695, %v311_v13 }
  0xda   : > { %v290_v32 = vrot.slane %v289_v25, 4  ;;  %v285_v34 = vrot.slane %v284_v28, 2  ;;  %v1072_v38 = vpop.xlane.xlu1 %246  ;;  %v280_v54 = vrot.slane %v279_v43, 1  ;;  %v314_v15 = vsub.f32 %v1050_v57, %v274_v60 }
  0xdb   : > { %v1074_v39 = vpop.xlane.xlu0 %243  ;;  %v315_v20 = vsub.f32 %v1048_v56, %v274_v60  ;;  %693 = vpow2.f32 %v332_v14 }
  0xdc   : > { %v291_v37 = vmax.f32 %v289_v25, %v290_v32  ;;  %v286_v47 = vmax.f32 %v284_v28, %v285_v34  ;;  %v296_v48 = vmax.f32 %v1074_v39, %v1072_v38  ;;  %v281_v4 = vmax.f32 %v279_v43, %v280_v54 }
  0xdd   : > { %v326_v25 = vmul.f32 1.442695, %v310_v3  ;;  %v334_v27 = vmul.f32 1.442695, %v314_v15  ;;  %v336_v31 = vmul.f32 1.442695, %v315_v20 }
  0xde   : > { %v292_v45 = vrot.slane %v291_v37, 2  ;;  %v287_v61 = vrot.slane %v286_v47, 1  ;;  %v297_v0 = vrot.slane %v296_v48, 4  ;;  %v316_v49 = vsub.f32 %v1056_v63, %v281_v4  ;;  %v1086_v32 = vpop.xlane.xlu1 %252 }
  0xdf   : > { %v317_v50 = vsub.f32 %v1054_v62, %v281_v4  ;;  %v1088_v33 = vpop.xlane.xlu0 %249  ;;  %695 = vpow2.f32 %v326_v25 }
  0xe0   : > { %v293_v55 = vmax.f32 %v291_v37, %v292_v45  ;;  %v288_v16 = vmax.f32 %v286_v47, %v287_v61  ;;  %v298_v19 = vmax.f32 %v296_v48, %v297_v0  ;;  %v338_v56 = vmul.f32 1.442695, %v316_v49 }
  0xe1   : > { %697 = vpow2.f32 %v328_v26  ;;  %v340_v34 = vmul.f32 1.442695, %v317_v50 }
  0xe2   : > { %v294_v7 = vrot.slane %v293_v55, 1  ;;  %v318_v28 = vsub.f32 %v1062_v12, %v288_v16  ;;  %v299_v52 = vrot.slane %v298_v19, 2  ;;  %v319_v57 = vsub.f32 %v1060_v11, %v288_v16 }
  0xe3   : > { %699 = vpow2.f32 %v334_v27  ;;  %v303_v12 = vmax.f32 %v1088_v33, %v1086_v32 }
  0xe4   : > { %v295_v51 = vmax.f32 %v293_v55, %v294_v7  ;;  %v342_v37 = vmul.f32 1.442695, %v318_v28  ;;  %v300_v40 = vmax.f32 %v298_v19, %v299_v52  ;;  %701 = vpow2.f32 %v336_v31 }
  0xe5   : > { %v344_v11 = vmul.f32 1.442695, %v319_v57  ;;  %703 = vpow2.f32 %v338_v56  ;;  %v304_v46 = vrot.slane %v303_v12, 4 }
  0xe6   : > { %v320_v63 = vsub.f32 %v1068_v22, %v295_v51  ;;  %v321_v62 = vsub.f32 %v1066_v21, %v295_v51  ;;  %705 = vpow2.f32 %v340_v34  ;;  %v301_v45 = vrot.slane %v300_v40, 1  ;;  %v692_v22 = vpop.eup %691 }
  0xe7   : > { %707 = vpow2.f32 %v342_v37  ;;  %v305_v47 = vmax.f32 %v303_v12, %v304_v46  ;;  %v416_v54 = vmul.f32 %v692_v22, %v963_v1 }
  0xe8   : > { %v346_v43 = vmul.f32 1.442695, %v320_v63  ;;  %v348_v44 = vmul.f32 1.442695, %v321_v62  ;;  %709 = vpow2.f32 %v344_v11  ;;  %v302_v21 = vmax.f32 %v300_v40, %v301_v45  ;;  %v694_v48 = vpop.eup %693 }
  0xe9   : > { %v417_v58 = vmul.f32 %v694_v48, %v971_v5  ;;  %v306_v60 = vrot.slane %v305_v47, 2  ;;  %v365_v3 = vadd.f32 %v694_v48, %v692_v22  ;;  %v439_v7 = vsel %vm205_vm0, %v416_v54, 0.0 }
  0xea   : > { %711 = vpow2.f32 %v346_v43  ;;  %v322_v59 = vsub.f32 %v1074_v39, %v302_v21  ;;  %v323_v13 = vsub.f32 %v1072_v38, %v302_v21 }
  0xeb   : > { %713 = vpow2.f32 %v348_v44  ;;  %v440_v15 = vsel %vm205_vm0, %v417_v58, 0.0  ;;  %v307_v5 = vmax.f32 %v305_v47, %v306_v60  ;;  %v366_v25 = vrot.slane %v365_v3, 4 }
  0xec   : > { %v696_v53 = vpop.eup %695  ;;  %v350_v16 = vmul.f32 1.442695, %v322_v59  ;;  %v441_v51 = vadd.f32 %v440_v15, %v439_v7  ;;  %v352_v50 = vmul.f32 1.442695, %v323_v13 }
  0xed   : > { %v414_v8 = vmul.f32 %v696_v53, %v966_v2  ;;  %v308_v52 = vrot.slane %v307_v5, 1 }
  0xee   : > { %v698_v55 = vpop.eup %697  ;;  %715 = vpow2.f32 %v350_v16  ;;  %v442_v34 = vrot.slane %v441_v51, 4 }
  0xef   : > { %v415_v1 = vmul.f32 %v698_v55, %v974_v6  ;;  %v358_v39 = vadd.f32 %v698_v55, %v696_v53  ;;  %v430_v26 = vsel %vm205_vm0, %v414_v8, 0.0  ;;  %717 = vpow2.f32 %v352_v50 }
  0xf0   : > { %v700_v61 = vpop.eup %699  ;;  %v367_v6 = vadd.f32 %v366_v25, %v365_v3  ;;  %v309_v63 = vmax.f32 %v307_v5, %v308_v52  ;;  %v1108_v48 = vadd.f32 %v442_v34, %v441_v51 }
  0xf1   : > { %v702_v0 = vpop.eup %701  ;;  %v431_v38 = vsel %vm205_vm0, %v415_v1, 0.0  ;;  %v359_v31 = vrot.slane %v358_v39, 4  ;;  %v418_v57 = vmul.f32 %v700_v61, %v982_v10 }
  0xf2   : > { %v704_v4 = vpop.eup %703  ;;  %v372_v27 = vadd.f32 %v702_v0, %v700_v61  ;;  %v432_v62 = vadd.f32 %v431_v38, %v430_v26  ;;  %v419_v37 = vmul.f32 %v702_v0, %v979_v9  ;;  %v324_v43 = vsub.f32 %v1088_v33, %v309_v63 }
  0xf3   : > { %v706_v14 = vpop.eup %705  ;;  %v325_v44 = vsub.f32 %v1086_v32, %v309_v63  ;;  %v360_v45 = vadd.f32 %v359_v31, %v358_v39  ;;  %v368_v46 = vrot.slane %v367_v6, 2  ;;  %v448_v53 = vsel %vm205_vm0, %v418_v57, 0.0 }
  0xf4   : > { %v708_v19 = vpop.eup %707  ;;  %v379_v28 = vadd.f32 %v706_v14, %v704_v4  ;;  %v373_v12 = vrot.slane %v372_v27, 4  ;;  %v354_v21 = vmul.f32 1.442695, %v324_v43  ;;  %v433_v10 = vrot.slane %v432_v62, 4 }
  0xf5   : > { %v710_v20 = vpop.eup %709  ;;  %v356_v47 = vmul.f32 1.442695, %v325_v44  ;;  %v449_v9 = vsel %vm205_vm0, %v419_v37, 0.0  ;;  %v361_v59 = vrot.slane %v360_v45, 2  ;;  %v420_v33 = vmul.f32 %v704_v4, %v994_v18 }
  0xf6   : > { %v386_v56 = vadd.f32 %v710_v20, %v708_v19  ;;  %v380_v11 = vrot.slane %v379_v28, 4  ;;  %v374_v55 = vadd.f32 %v373_v12, %v372_v27  ;;  %719 = vpow2.f32 %v354_v21 }
  0xf7   : > { %v712_v49 = vpop.eup %711  ;;  %721 = vpow2.f32 %v356_v47  ;;  %v421_v32 = vmul.f32 %v706_v14, %v991_v17  ;;  %v369_v61 = vadd.f32 %v368_v46, %v367_v6  ;;  %v450_v0 = vadd.f32 %v449_v9, %v448_v53 }
  0xf8   : > { %v714_v2 = vpop.eup %713  ;;  %v387_v22 = vrot.slane %v386_v56, 4  ;;  %v381_v58 = vadd.f32 %v380_v11, %v379_v28  ;;  %v444_v8 = vrot.slane %v1108_v48, 2  ;;  %v1115_v13 = vadd.f32 %v433_v10, %v432_v62 }
  0xf9   : > { %v393_v40 = vadd.f32 %v714_v2, %v712_v49  ;;  %v375_v15 = vrot.slane %v374_v55, 2  ;;  %v362_v16 = vadd.f32 %v361_v59, %v360_v45  ;;  %v457_v5 = vsel %vm205_vm0, %v420_v33, 0.0 }
  0xfa   : > { %v388_v60 = vadd.f32 %v387_v22, %v386_v56  ;;  %v382_v1 = vrot.slane %v381_v58, 2  ;;  %v422_v39 = vmul.f32 %v708_v19, %v1004_v24  ;;  %v423_v18 = vmul.f32 %v710_v20, %v1001_v23 }
  0xfb   : > { %v394_v54 = vrot.slane %v393_v40, 4  ;;  %v716_v7 = vpop.eup %715  ;;  %v458_v17 = vsel %vm205_vm0, %v421_v32, 0.0  ;;  %v424_v25 = vmul.f32 %v712_v49, %v1014_v30  ;;  %v425_v51 = vmul.f32 %v714_v2, %v1011_v29 }
  0xfc   : > { %v718_v4 = vpop.eup %717  ;;  %v389_v14 = vrot.slane %v388_v60, 2  ;;  %v426_v38 = vmul.f32 %v716_v7, %v1024_v36  ;;  %v370_v28 = vrot.slane %v369_v61, 1  ;;  %v376_v52 = vadd.f32 %v375_v15, %v374_v55 }
  0xfd   : > { %v395_v3 = vadd.f32 %v394_v54, %v393_v40  ;;  %v400_v50 = vadd.f32 %v718_v4, %v716_v7  ;;  %v427_v27 = vmul.f32 %v718_v4, %v1021_v35  ;;  %v451_v31 = vrot.slane %v450_v0, 4 }
  0xfe   : > { %v383_v24 = vadd.f32 %v382_v1, %v381_v58  ;;  %v363_v19 = vrot.slane %v362_v16, 1  ;;  %v466_v23 = vsel %vm205_vm0, %v422_v39, 0.0  ;;  %v467_v20 = vsel %vm205_vm0, %v423_v18, 0.0 }
  0xff   : > { %v396_v26 = vrot.slane %v395_v3, 2  ;;  %v401_v6 = vrot.slane %v400_v50, 4  ;;  %v459_v57 = vadd.f32 %v458_v17, %v457_v5  ;;  %v390_v30 = vadd.f32 %v389_v14, %v388_v60 }
 0x100   : > { %v475_v29 = vsel %vm205_vm0, %v424_v25, 0.0  ;;  %v476_v49 = vsel %vm205_vm0, %v425_v51, 0.0  ;;  %v484_v35 = vsel %vm205_vm0, %v426_v38, 0.0  ;;  %v485_v56 = vsel %vm205_vm0, %v427_v27, 0.0 }
 0x101   : > { %v397_v2 = vadd.f32 %v396_v26, %v395_v3  ;;  %v402_v36 = vadd.f32 %v401_v6, %v400_v50  ;;  %v371_v63 = vadd.f32 %v370_v28, %v369_v61  ;;  %v377_v34 = vrot.slane %v376_v52, 1 }
 0x102   : > { %v384_v62 = vrot.slane %v383_v24, 1  ;;  %v468_v37 = vadd.f32 %v467_v20, %v466_v23  ;;  %v364_v12 = vadd.f32 %v363_v19, %v362_v16  ;;  %v452_v11 = vadd.f32 %v451_v31, %v450_v0 }
 0x103   : > { %v720_v40 = vpop.eup %719  ;;  %v477_v43 = vadd.f32 %v476_v49, %v475_v29  ;;  %v403_v44 = vrot.slane %v402_v36, 2  ;;  %v460_v46 = vrot.slane %v459_v57, 4  ;;  %v391_v22 = vrot.slane %v390_v30, 1 }
 0x104   : > { %v722_v45 = vpop.eup %721  ;;  %v486_v21 = vadd.f32 %v485_v56, %v484_v35  ;;  %v428_v47 = vmul.f32 %v720_v40, %v1034_v42  ;;  %v398_v10 = vrot.slane %v397_v2, 1  ;;  %v378_v9 = vadd.f32 %v377_v34, %v376_v52 }
 0x105   : > { %v404_v53 = vadd.f32 %v403_v44, %v402_v36  ;;  %v407_v54 = vadd.f32 %v722_v45, %v720_v40  ;;  %v429_v55 = vmul.f32 %v722_v45, %v1031_v41  ;;  %v385_v58 = vadd.f32 %v384_v62, %v383_v24 }
 0x106   : > { %v469_v59 = vrot.slane %v468_v37, 4  ;;  %v493_v33 = vsel %vm205_vm0, %v428_v47, 0.0  ;;  %v478_v32 = vrot.slane %v477_v43, 4  ;;  %723 = vrcp.f32 %v371_v63 }
 0x107   : > { %v405_v60 = vrot.slane %v404_v53, 1  ;;  %v408_v61 = vrot.slane %v407_v54, 4  ;;  %v494_v0 = vsel %vm205_vm0, %v429_v55, 0.0  ;;  %v392_v3 = vadd.f32 %v391_v22, %v390_v30 }
 0x108   : > { %v487_v7 = vrot.slane %v486_v21, 4  ;;  %v495_v15 = vadd.f32 %v494_v0, %v493_v33  ;;  %725 = vrcp.f32 %v364_v12  ;;  %v461_v42 = vadd.f32 %v460_v46, %v459_v57 }
 0x109   : > { %v399_v1 = vadd.f32 %v398_v10, %v397_v2  ;;  %v409_v16 = vadd.f32 %v408_v61, %v407_v54  ;;  %v435_v41 = vrot.slane %v1115_v13, 2  ;;  %727 = vrcp.f32 %v378_v9 }
 0x10a   : > { %v470_v5 = vadd.f32 %v469_v59, %v468_v37  ;;  %v406_v39 = vadd.f32 %v405_v60, %v404_v53  ;;  %729 = vrcp.f32 %v385_v58  ;;  %v479_v18 = vadd.f32 %v478_v32, %v477_v43 }
 0x10b   : > { %v410_v4 = vrot.slane %v409_v16, 2  ;;  %v496_v17 = vrot.slane %v495_v15, 4  ;;  %v453_v14 = vrot.slane %v452_v11, 2  ;;  %731 = vrcp.f32 %v392_v3 }
 0x10c   : > { %v488_v25 = vadd.f32 %v487_v7, %v486_v21  ;;  %v462_v51 = vrot.slane %v461_v42, 2  ;;  %733 = vrcp.f32 %v399_v1  ;;  %v445_v50 = vadd.f32 %v444_v8, %v1108_v48 }
 0x10d   : > { %v411_v26 = vadd.f32 %v410_v4, %v409_v16  ;;  %v471_v38 = vrot.slane %v470_v5, 2  ;;  %735 = vrcp.f32 %v406_v39  ;;  %v436_v27 = vadd.f32 %v435_v41, %v1115_v13 }
 0x10e   : > { %v480_v28 = vrot.slane %v479_v18, 2  ;;  %v497_v31 = vadd.f32 %v496_v17, %v495_v15  ;;  %v454_v24 = vadd.f32 %v453_v14, %v452_v11  ;;  %v489_v19 = vrot.slane %v488_v25, 2 }
 0x10f   : > { %v412_v52 = vrot.slane %v411_v26, 1  ;;  %v463_v23 = vadd.f32 %v462_v51, %v461_v42  ;;  %v446_v6 = vrot.slane %v445_v50, 1  ;;  %v472_v57 = vadd.f32 %v471_v38, %v470_v5 }
 0x110   : > { %v437_v30 = vrot.slane %v436_v27, 1  ;;  %v481_v29 = vadd.f32 %v480_v28, %v479_v18  ;;  %v498_v49 = vrot.slane %v497_v31, 2  ;;  %v455_v2 = vrot.slane %v454_v24, 1 }
 0x111   : > { %v413_v20 = vadd.f32 %v412_v52, %v411_v26  ;;  %v490_v48 = vadd.f32 %v489_v19, %v488_v25  ;;  %v464_v36 = vrot.slane %v463_v23, 1  ;;  %v473_v13 = vrot.slane %v472_v57, 1 }
 0x112   : > { %v447_v63 = vadd.f32 %v446_v6, %v445_v50  ;;  %v438_v34 = vadd.f32 %v437_v30, %v436_v27  ;;  %v482_v62 = vrot.slane %v481_v29, 1  ;;  %v499_v37 = vadd.f32 %v498_v49, %v497_v31 }
 0x113   : > { %737 = vrcp.f32 %v413_v20  ;;  %v724_v8 = vpop.eup %723  ;;  %v456_v12 = vadd.f32 %v455_v2, %v454_v24  ;;  %v491_v11 = vrot.slane %v490_v48, 1  ;;  %v465_v44 = vadd.f32 %v464_v36, %v463_v23 }
 0x114   : > { %v505_v46 = vmul.f32 %v724_v8, %v447_v63  ;;  %v474_v21 = vadd.f32 %v473_v13, %v472_v57  ;;  %v483_v53 = vadd.f32 %v482_v62, %v481_v29  ;;  %v500_v54 = vrot.slane %v499_v37, 1 }
 0x115   : > { %v726_v35 = vpop.eup %725  ;;  %v492_v9 = vadd.f32 %v491_v11, %v490_v48 }
 0x116   : > { %v728_v56 = vpop.eup %727  ;;  %v503_v45 = vmul.f32 %v726_v35, %v438_v34  ;;  %v501_v61 = vadd.f32 %v500_v54, %v499_v37 }
 0x117   : > { %v730_v40 = vpop.eup %729  ;;  %v507_v47 = vmul.f32 %v728_v56, %v456_v12 }
 0x118   : > { %v732_v43 = vpop.eup %731  ;;  %v509_v55 = vmul.f32 %v730_v40, %v465_v44  ;;  %v527_v33 = vsel %vm526_vm1, %v505_v46, %v503_v45 }
 0x119   : > { %v734_v22 = vpop.eup %733  ;;  %v511_v58 = vmul.f32 %v732_v43, %v474_v21  ;;  %v529_v60 = vsel %vm528_vm2, %v507_v47, %v527_v33 }
 0x11a   : > { %v736_v10 = vpop.eup %735  ;;  %v513_v59 = vmul.f32 %v734_v22, %v483_v53  ;;  %v531_v0 = vsel %vm530_vm3, %v509_v55, %v529_v60 }
 0x11b   : > { %v515_v32 = vmul.f32 %v736_v10, %v492_v9  ;;  %v533_v7 = vsel %vm532_vm4, %v511_v58, %v531_v0 }
 0x11c   : > { %v535_v42 = vsel %vm534_vm5, %v513_v59, %v533_v7 }
 0x11d   : > { %v537_v1 = vsel %vm536_vm6, %v515_v32, %v535_v42 }
 0x120   : > { %v738_v3 = vpop.eup %737 }
 0x121   : > { %v517_v15 = vmul.f32 %v738_v3, %v501_v61 }
 0x123   : > { %v539_v16 = vsel %vm538_vm7, %v517_v15, %v537_v1 }
 0x124   : > { %541 = vst.msk [vmem:[%s162_s4] sm:$0xff] %vm205_vm0, %v539_v16 }
 0x125   : > { %780 = shalt.err (!%p777_p10)
}
 0x126   : > { %s781_s25 = scalar_lea.hbm %s1145_s16, 128  ;;  %s785_s29 = scalar_lea.hbm %s1185_s2, 256 }
 0x127   : > { %p782_p0 = scmp.ne.s32.totalorder %s1145_s16, %s781_s25  ;;  %p786_p1 = scmp.lt.s32.totalorder %s1145_s16, %s1185_s2 }
 0x128   : > { %p787_p3 = scmp.lt.s32.totalorder %s785_s29, %s781_s25 }
 0x129   : > { %p783_p2 = pnand %p782_p0, %p1194_p12 }
 0x12a   : > { %p788_p6 = por %p787_p3, %p786_p1 }
 0x12b   : > { %p784_p9 = pneg %p783_p2 }
 0x12d   : > { %p789_p11 = pnand %p788_p6, %p784_p9 }
 0x12f   : > { %792 = shalt.err (!%p789_p11)
}
 0x130   : > { %645 = dma.vmem_to_hbm [thread:$0]  (%p1194_p12), %s557_s7, 128, %s1145_s16, %s543_s17  }
 0x131 PF: > { %s568_s28 = sand.u32 1, %s819_s9   ;;  %p1195_p13 = scmp.ne.s32.totalorder %s1191_s22, 0 }
 0x132   : > { %p1196_p4 = scmp.ge.s32.totalorder %s831_s12, 2  ;;  %s569_s30 = scalar_lea.sflag [#allocation4], %s568_s28 }
 0x134   : > { %p652_p5 = pnand %p1196_p4, %p1195_p13 }
 0x136   : > { %p653_p7 = pneg %p652_p5 }
 0x138   : > { %814 = dma.done.wait (%p653_p7), %s569_s30, 128  }
 0x139   : > { %816 = vsyncadd (%p653_p7), %s569_s30, 4294967168  ;;  %p15_p8 = scmp.ge.s32.totalorder %s877_s15, 4   ;;  %s1197_s9 = smov %s823_s10 }
 0x13a   : > { %s1198_s10 = smov %s827_s11  ;;  %s1199_s11 = smov %s889_s18 }
 0x13b   : > { %s1200_s12 = smov %s877_s15  ;;  %17 = sbr.rel (!%p15_p8) target bundleno = 5 (0x5), region = 74 }
 0x140   :  { %574 = vsyncpa [#allocation3], 1 }
 0x141   :  { %576 = vsyncpa [#allocation3 + $0x1], 1 }
 0x142   :  { %577 = vsyncpa [#allocation4], 1 }
 0x143   :  { %579 = vsyncpa [#allocation4 + $0x1], 1 }

</bundles_post_ra>
